<compile_context>
chip_gen: v7x
topology: tpu7x:2x2x1
jax: 0.10.0
libtpu: 0.0.40
codegen_flags: <defaults>
</compile_context>

<pallas_src>
import functools

import jax
import jax.numpy as jnp
from jax.experimental import pallas as pl
from jax.experimental.pallas import tpu as pltpu


def _round_up(a, b):
    return ((a + b - 1) // b) * b


def _gaussian_embed_kernel(x_ref, o_ref, *, embed_dim, dk, grid_left, grid_step,
                           neg_inv_list, post_scale, normalization, exp_dtype):
    # x_ref: (TM, 1) block of flattened (B*S, 1) inputs
    # o_ref: (TM, D) output block
    x = x_ref[...].astype(jnp.float32)                               # (TM, 1)

    # Build grid centers and -1/(2*std^2) per lane from an iota (no integer
    # div/rem; K is a small static Python loop -> compares + selects on VPU).
    lane = jax.lax.broadcasted_iota(jnp.int32, (1, embed_dim), 1)    # (1, D)
    lane_f = lane.astype(jnp.float32)
    grid = jnp.zeros((1, embed_dim), jnp.float32)
    neg_inv = jnp.zeros((1, embed_dim), jnp.float32)
    for k, ninv in enumerate(neg_inv_list):
        in_blk = jnp.logical_and(lane >= k * dk, lane < (k + 1) * dk)
        grid = jnp.where(in_blk,
                         grid_left + (lane_f - float(k * dk)) * grid_step,
                         grid)
        neg_inv = jnp.where(in_blk, jnp.float32(ninv), neg_inv)

    diff = x - grid                                                  # (TM, D) VPU broadcast
    z = diff * diff * neg_inv                                        # VPU
    emb = jnp.exp(z.astype(exp_dtype)).astype(jnp.float32)           # EUP

    if normalization == "norm":
        denom = jnp.sqrt(jnp.sum(emb * emb, axis=-1, keepdims=True))
        emb = emb / denom

    # TODO(synk): for embed_dim < 128 the store is lane-masked; a lane-dense
    # repack (128 // D rows per output row) was considered but EUP exp / HBM
    # writeback dominate this kernel, so it is not applied here.
    o_ref[...] = (emb * post_scale).astype(o_ref.dtype)


def gaussian_embedder_forward(
    x,
    *,
    embed_dim,
    std_dev_list,
    left_bound=-2.0,
    right_bound=13.0,
    normalization="step",
    scale=1.0,
    row_tile=None,
    out_dtype=None,
    exp_dtype=jnp.float32,
    vmem_limit_bytes=32 * 1024 * 1024,
):
    """Pallas implementation of GaussianEmbedder.forward.

    x: (B, S, 1) float.  Returns (B, S, embed_dim) in out_dtype (default x.dtype).
    """
    assert x.ndim == 3 and x.shape[-1] == 1
    B, S, _ = x.shape
    K = len(std_dev_list)
    assert embed_dim % K == 0, "embed_dim must be divisible by len(std_dev_list)"
    dk = embed_dim // K
    out_dtype = x.dtype if out_dtype is None else out_dtype

    # Host-side constants (match module __init__; 'equally_spaced'/'uniform' grid).
    # TODO(synk): embed_grid='normal' (random grid buffer) not supported here.
    grid_left = float(left_bound)
    grid_step = float(right_bound - left_bound) / (dk - 1) if dk > 1 else 0.0
    neg_inv_list = tuple(-1.0 / (2.0 * float(s) ** 2) for s in std_dev_list)

    step_size = (float(right_bound) - float(left_bound)) / embed_dim
    if normalization == "step":
        post_scale = float(step_size) ** 0.5 * float(scale)
    elif normalization in (None, "none", "norm"):
        post_scale = float(scale)
    else:
        raise NotImplementedError(normalization)

    M = B * S
    x_rows = x.reshape(M, 1).astype(jnp.float32)

    # ---- VMEM-budgeted row-tile selection (portable v5e / v6e / v7x) ----
    if row_tile is None:
        lanes_out = _round_up(max(embed_dim, 128), 128)          # lane padding
        out_itemsize = jnp.dtype(out_dtype).itemsize
        # double-buffered output block + double-buffered x block, per row
        per_row_bytes = 2 * lanes_out * out_itemsize + 2 * 128 * 4
        budget = min(vmem_limit_bytes // 2, 12 * 1024 * 1024)    # leave headroom
        row_tile = budget // per_row_bytes
        row_tile = int(max(8, min(row_tile, 1024)))
    row_tile = min(row_tile, _round_up(M, 8))
    row_tile = max(8, (row_tile // 8) * 8)                       # sublane multiple

    # Ragged B*S: pad rows up to a tile multiple, slice afterwards.
    M_pad = _round_up(M, row_tile)
    if M_pad != M:
        x_rows = jnp.pad(x_rows, ((0, M_pad - M), (0, 0)))

    kernel = functools.partial(
        _gaussian_embed_kernel,
        embed_dim=embed_dim,
        dk=dk,
        grid_left=grid_left,
        grid_step=grid_step,
        neg_inv_list=neg_inv_list,
        post_scale=post_scale,
        normalization=normalization,
        exp_dtype=exp_dtype,
    )

    out_rows = pl.pallas_call(
        kernel,
        out_shape=jax.ShapeDtypeStruct((M_pad, embed_dim), out_dtype),
        grid_spec=pltpu.PrefetchScalarGridSpec(
            num_scalar_prefetch=0,
            grid=(M_pad // row_tile,),
            in_specs=[pl.BlockSpec((row_tile, 1), lambda i: (i, 0))],
            out_specs=pl.BlockSpec((row_tile, embed_dim), lambda i: (i, 0)),
        ),
        compiler_params=pltpu.CompilerParams(
            dimension_semantics=("parallel",),   # lets v7x split rows across its 2 TCs
            vmem_limit_bytes=vmem_limit_bytes,
        ),
    )(x_rows)

    if M_pad != M:
        out_rows = out_rows[:M]
    return out_rows.reshape(B, S, embed_dim)


def _reference_forward(x, *, embed_dim, std_dev_list, left_bound, right_bound,
                       normalization="step", scale=1.0):
    # Pure-JAX reference mirroring the PyTorch forward.
    K = len(std_dev_list)
    dk = embed_dim // K
    sub_grid = jnp.linspace(left_bound, right_bound, dk,
                            dtype=jnp.float32).reshape(1, 1, dk)
    pieces = [jnp.exp(-((x - sub_grid) ** 2) / (2.0 * float(s) ** 2))
              for s in std_dev_list]
    emb = jnp.concatenate(pieces, axis=2)                       # (B, S, D)
    step_size = (right_bound - left_bound) / embed_dim
    if normalization == "step":
        emb = emb * jnp.sqrt(jnp.float32(step_size))
    elif normalization == "norm":
        emb = emb / jnp.linalg.norm(emb, axis=2, keepdims=True)
    return emb * scale


if __name__ == "__main__":
    embed_dim = 32
    std_dev_list = [0.5, 1.0]
    left_bound, right_bound = -2.0, 13.0

    # Case 1: B*S already a multiple of the (clamped) tile.
    B, S = 2, 8
    x = jax.random.uniform(jax.random.PRNGKey(0), (B, S, 1), dtype=jnp.float32,
                           minval=left_bound, maxval=right_bound)
    out = gaussian_embedder_forward(
        x, embed_dim=embed_dim, std_dev_list=std_dev_list,
        left_bound=left_bound, right_bound=right_bound,
        normalization="step", scale=1.0)
    out = jax.block_until_ready(out)
    ref = _reference_forward(
        x, embed_dim=embed_dim, std_dev_list=std_dev_list,
        left_bound=left_bound, right_bound=right_bound,
        normalization="step", scale=1.0)
    assert out.shape == (B, S, embed_dim)
    assert jnp.allclose(out, ref, atol=2e-5, rtol=1e-4), "mismatch vs reference"

    # Case 2: ragged B*S (exercises the padding path).
    B2, S2 = 3, 5
    x2 = jax.random.uniform(jax.random.PRNGKey(1), (B2, S2, 1), dtype=jnp.float32,
                            minval=left_bound, maxval=right_bound)
    out2 = gaussian_embedder_forward(
        x2, embed_dim=embed_dim, std_dev_list=std_dev_list,
        left_bound=left_bound, right_bound=right_bound,
        normalization="step", scale=1.0)
    out2 = jax.block_until_ready(out2)
    ref2 = _reference_forward(
        x2, embed_dim=embed_dim, std_dev_list=std_dev_list,
        left_bound=left_bound, right_bound=right_bound,
        normalization="step", scale=1.0)
    assert out2.shape == (B2, S2, embed_dim)
    assert jnp.allclose(out2, ref2, atol=2e-5, rtol=1e-4), "mismatch vs reference (ragged)"

    print("KERNEL_OK")
</pallas_src>

<mosaic_0001>
module attributes {stable_mosaic.version = 11 : i64} {
  func.func @_gaussian_embed_kernel(%arg0: i32, %arg1: memref<16x1xf32, #tpu.memory_space<vmem>>, %arg2: memref<16x32xf32, #tpu.memory_space<vmem>>) attributes {dimension_semantics = [#tpu.dimension_semantics<parallel>], iteration_bounds = array<i64: 1>, scalar_prefetch = 0 : i64, scratch_operands = 0 : i64, tpu.core_type = #tpu.core_type<tc>, window_params = [{transform_indices = @transform_0, window_bounds = array<i64: 16, 1>}, {transform_indices = @transform_1, window_bounds = array<i64: 16, 32>}]} {
    %c0 = arith.constant 0 : index
    %c0_0 = arith.constant 0 : index
    %0 = vector.load %arg1[%c0, %c0_0] : memref<16x1xf32, #tpu.memory_space<vmem>>, vector<16x1xf32>
    %1 = tpu.iota {dimensions = array<i32: 1>} : vector<1x32xi32>
    %2 = arith.sitofp %1 : vector<1x32xi32> to vector<1x32xf32>
    %cst = arith.constant 0.000000e+00 : f32
    %3 = vector.broadcast %cst : f32 to vector<1x32xf32>
    %cst_1 = arith.constant 0.000000e+00 : f32
    %4 = vector.broadcast %cst_1 : f32 to vector<1x32xf32>
    %c0_i32 = arith.constant 0 : i32
    %5 = vector.broadcast %c0_i32 : i32 to vector<1x32xi32>
    %6 = arith.cmpi sge, %1, %5 : vector<1x32xi32>
    %c16_i32 = arith.constant 16 : i32
    %7 = vector.broadcast %c16_i32 : i32 to vector<1x32xi32>
    %8 = arith.cmpi slt, %1, %7 : vector<1x32xi32>
    %9 = arith.andi %6, %8 : vector<1x32xi1>
    %cst_2 = arith.constant 0.000000e+00 : f32
    %10 = vector.broadcast %cst_2 : f32 to vector<1x32xf32>
    %11 = arith.subf %2, %10 : vector<1x32xf32>
    %cst_3 = arith.constant 1.000000e+00 : f32
    %12 = vector.broadcast %cst_3 : f32 to vector<1x32xf32>
    %13 = arith.mulf %11, %12 : vector<1x32xf32>
    %cst_4 = arith.constant -2.000000e+00 : f32
    %14 = vector.broadcast %cst_4 : f32 to vector<1x32xf32>
    %15 = arith.addf %14, %13 : vector<1x32xf32>
    %16 = arith.select %9, %15, %3 : vector<1x32xi1>, vector<1x32xf32>
    %cst_5 = arith.constant -2.000000e+00 : f32
    %17 = vector.broadcast %cst_5 : f32 to vector<1x32xf32>
    %18 = arith.select %9, %17, %4 : vector<1x32xi1>, vector<1x32xf32>
    %c16_i32_6 = arith.constant 16 : i32
    %19 = vector.broadcast %c16_i32_6 : i32 to vector<1x32xi32>
    %20 = arith.cmpi sge, %1, %19 : vector<1x32xi32>
    %c32_i32 = arith.constant 32 : i32
    %21 = vector.broadcast %c32_i32 : i32 to vector<1x32xi32>
    %22 = arith.cmpi slt, %1, %21 : vector<1x32xi32>
    %23 = arith.andi %20, %22 : vector<1x32xi1>
    %cst_7 = arith.constant 1.600000e+01 : f32
    %24 = vector.broadcast %cst_7 : f32 to vector<1x32xf32>
    %25 = arith.subf %2, %24 : vector<1x32xf32>
    %cst_8 = arith.constant 1.000000e+00 : f32
    %26 = vector.broadcast %cst_8 : f32 to vector<1x32xf32>
    %27 = arith.mulf %25, %26 : vector<1x32xf32>
    %cst_9 = arith.constant -2.000000e+00 : f32
    %28 = vector.broadcast %cst_9 : f32 to vector<1x32xf32>
    %29 = arith.addf %28, %27 : vector<1x32xf32>
    %30 = arith.select %23, %29, %16 : vector<1x32xi1>, vector<1x32xf32>
    %cst_10 = arith.constant -5.000000e-01 : f32
    %31 = vector.broadcast %cst_10 : f32 to vector<1x32xf32>
    %32 = arith.select %23, %31, %18 : vector<1x32xi1>, vector<1x32xf32>
    %33 = vector.broadcast %0 : vector<16x1xf32> to vector<16x32xf32>
    %34 = vector.broadcast %30 : vector<1x32xf32> to vector<16x32xf32>
    %35 = arith.subf %33, %34 : vector<16x32xf32>
    %36 = arith.mulf %35, %35 : vector<16x32xf32>
    %37 = vector.broadcast %32 : vector<1x32xf32> to vector<16x32xf32>
    %38 = arith.mulf %36, %37 : vector<16x32xf32>
    %39 = math.exp %38 : vector<16x32xf32>
    %cst_11 = arith.constant 0.684653222 : f32
    %40 = vector.broadcast %cst_11 : f32 to vector<16x32xf32>
    %41 = arith.mulf %39, %40 : vector<16x32xf32>
    %c0_12 = arith.constant 0 : index
    %c0_13 = arith.constant 0 : index
    %42 = vector.load %arg2[%c0_12, %c0_13] : memref<16x32xf32, #tpu.memory_space<vmem>>, vector<16x32xf32>
    tpu.vector_store %arg2[%c0_12, %c0_13], %41 {strides = array<i32>} : memref<16x32xf32, #tpu.memory_space<vmem>>, vector<16x32xf32>,
    return
  }
  func.func @transform_0(%arg0: i32) -> (i32, i32) {
    %c0_i32 = arith.constant 0 : i32
    %c0_i32_0 = arith.constant 0 : i32
    return %arg0, %c0_i32 : i32, i32
  }
  func.func @transform_1(%arg0: i32) -> (i32, i32) {
    %c0_i32 = arith.constant 0 : i32
    %c0_i32_0 = arith.constant 0 : i32
    return %arg0, %c0_i32 : i32, i32
  }
}

</mosaic_0001>

<bundles_post_ra>
// kernel: tpu_custom_call.1
= control target key start
LH: loop header
LB: loop body
LE: loop exit
PB: predicated region body
PF: predicated region fallthrough
CT: control target
= control target key end

     0   :  { %s136_s0 = inlined_call_operand.vmem [shape: f32[16,1], index: 0, kind: input, shape index: {}]   ;;  %s137_s1 = inlined_call_operand.hbm [shape: f32[16,32], index: 1, kind: output, shape index: {}]  }
   0x1   :  { %v9_v0 = vld [vmem:[%s136_s0] sm:$0xff] }
   0x2   :  { %6 = vsyncpa [#allocation3], 0  ;;  %v103_v1 = vmov 0   ;;  %v10_v2 = vld [vmem:[%s136_s0 + $0x8] sm:$0xff]  ;;  %v11_v3 = vlaneseq  ;;  %v104_v11 = vmov 0.0   ;;  %vm49_vm4 = vcmask 261120  }
   0x3   :  { %74 = vset.pattern.permute.xlu0 %v103_v1  ;;  %s105_s0 = smov [#allocation2]  }
   0x4   :  { %29 = vperm.xlu0 %74, %v9_v0   ;;  %v12_v4 = vand.u32 127, %v11_v3  ;;  %s57_s10 = sshll.u32 %s105_s0, 4  ;;  %s58_s10 = int_to_ptr.vmem [resolvable:$true] %s57_s10 }
   0x5   :  { %s79_s11 = scalar_lea.vmem %s58_s10, 256  ;;  %p84_p1 = scmp.lt.s32.totalorder %s58_s10, %s58_s10 }
   0x6   :  { %v13_v5 = vcvt.s32.f32 %v12_v4  ;;  %vm15_vm0 = vcmp.lt.s32.totalorder %v12_v4, 16  ;;  %vm20_vm1 = vcmp.ge.s32.totalorder %v12_v4, 16  ;;  %vm21_vm2 = vcmp.lt.s32.totalorder %v12_v4, 32  ;;  %p80_p0 = scmp.ne.s32.totalorder %s58_s10, %s79_s11  ;;  %p85_p2 = scmp.lt.s32.totalorder %s79_s11, %s79_s11 }
   0x7   :  { %vm22_vm3 = vmand %vm20_vm1, %vm21_vm2  ;;  %v19_v12 = vsel %vm15_vm0, -2.0, %v104_v11 }
   0x8   :  { %34 = vperm.xlu0 %74, %v10_v2   ;;  %v68_v6 = vadd.f32 -16.0, %v13_v5  ;;  %v17_v7 = vadd.f32 -2.0, %v13_v5  ;;  %v26_v15 = vsel %vm22_vm3, -0.5, %v19_v12  ;;  %p86_p3 = por %p85_p2, %p84_p1 }
   0xa   :  { %v24_v8 = vadd.f32 -2.0, %v68_v6  ;;  %v18_v9 = vsel %vm15_vm0, %v17_v7, 0.0  ;;  %p87_p4 = pnand %p86_p3, %p80_p0 }
   0xc   :  { %v25_v10 = vsel %vm22_vm3, %v24_v8, %v18_v9 }
  0x83   :  { %v30_v13 = vpop.permute.xlu0 %29 }
  0x84   :  { %v37_v14 = vsub.f32 %v30_v13, %v25_v10 }
  0x86   :  { %v39_v16 = vmul.f32 %v37_v14, %v37_v14 }
  0x87   :  { %v35_v17 = vpop.permute.xlu0 %34 }
  0x88   :  { %v41_v18 = vmul.f32 %v39_v16, %v26_v15  ;;  %v38_v19 = vsub.f32 %v35_v17, %v25_v10 }
  0x8a   :  { %v43_v20 = vmul.f32 1.442695, %v41_v18  ;;  %v40_v21 = vmul.f32 %v38_v19, %v38_v19 }
  0x8c   :  { %75 = vpow2.f32 %v43_v20  ;;  %v42_v22 = vmul.f32 %v40_v21, %v26_v15 }
  0x8e   :  { %v45_v23 = vmul.f32 1.442695, %v42_v22 }
  0x90   :  { %77 = vpow2.f32 %v45_v23 }
  0x96   :  { %v76_v24 = vpop.eup %75 }
  0x97   :  { %v47_v25 = vmul.f32 0.6846532, %v76_v24 }
  0x99   :  { %50 = vst.msk [vmem:[#allocation2] sm:$0xff] %vm49_vm4, %v47_v25 }
  0x9a   :  { %v78_v26 = vpop.eup %77 }
  0x9b   :  { %v48_v27 = vmul.f32 0.6846532, %v78_v26 }
  0x9d   :  { %51 = vst.msk [vmem:[#allocation2 + $0x8] sm:$0xff] %vm49_vm4, %v48_v27 }
  0x9e   :  { %90 = shalt.err (!%p87_p4)
}
  0x9f   :  { %s91_s14 = scalar_lea.hbm %s137_s1, 256 }
  0xa0   :  { %p92_p5 = scmp.ne.s32.totalorder %s137_s1, %s91_s14  ;;  %p95_p6 = scmp.lt.u32.totalorder %s91_s14, %s137_s1 }
  0xa2   :  { %p97_p7 = pnand %p95_p6, %p92_p5 }
  0xa4   :  { %100 = shalt.err (!%p97_p7)
}
  0xa5   :  { %s106_s19 = smov 128   ;;  %s107_s20 = smov 8  }
  0xa6   :  { %63 = dma.vmem_to_hbm [thread:$0]  %s58_s10, 256, %s137_s1, [#allocation3], %s106_s19, %s106_s19, %s107_s20  }
  0xa7   :  { %101 = dma.done.wait [#allocation3], 256  }
  0xa8   :  { %102 = vsyncadd [#allocation3], 4294967040 }
  0xa9   :  { %67 = vsyncpa [#allocation3], 1 }

</bundles_post_ra>
